<compile_context>
chip_gen: v6e
topology: v6e:2x2x1
jax: 0.10.0
libtpu: 0.0.40
codegen_flags: <defaults>
</compile_context>

<pallas_src>
import functools

import jax
import jax.numpy as jnp
from jax.experimental import pallas as pl
from jax.experimental.pallas import tpu as pltpu


def _dwconv3x3_kernel(x_ref, w_ref, b_ref, m_ref, o_ref, *, H, W):
    """One (batch, channel-tile) block of a depthwise 3x3 conv, stride 1, pad 1.

    x_ref : (1, TC, H*W)  input block (channels on sublanes, pixels on lanes)
    w_ref : (TC, 9)       per-channel 3x3 taps, k = kh*3 + kw
    b_ref : (TC, 1)       per-channel bias
    m_ref : (4, H*W)      float border masks:
                          row 0: 1.0 where col <= W-2   (pre-mask for dw = -1 taps)
                          row 1: 1.0 where col >= 1     (pre-mask for dw = +1 taps)
                          row 2: 1.0 where row >= 1     (output mask for dh = -1)
                          row 3: 1.0 where row <= H-2   (output mask for dh = +1)
    o_ref : (1, TC, H*W)  output block
    """
    HW = H * W
    x = x_ref[0].astype(jnp.float32)            # (TC, HW)
    w = w_ref[...].astype(jnp.float32)          # (TC, 9)
    b = b_ref[...].astype(jnp.float32)          # (TC, 1)

    cmask_l = m_ref[0:1, :]                     # (1, HW) zero at col == W-1
    cmask_r = m_ref[1:2, :]                     # (1, HW) zero at col == 0
    rmask_t = m_ref[2:3, :]                     # (1, HW) zero at row == 0
    rmask_b = m_ref[3:4, :]                     # (1, HW) zero at row == H-1

    # Column-pre-masked copies of x: zeroing the source element that would wrap
    # across a row boundary makes every horizontal tap a pure lane roll.
    xl = x * cmask_l                            # feeds all dw = -1 taps
    xr = x * cmask_r                            # feeds all dw = +1 taps

    def tap(src, dh, dw):
        # src[p + dh*W + dw] via lane roll (roll(a, s)[p] == a[(p - s) mod HW]).
        s = dh * W + dw
        return src if s == 0 else pltpu.roll(src, shift=(-s) % HW, axis=1)

    def wk(k):
        return w[:, k:k + 1]                    # (TC, 1), lane-broadcasts

    # Per-source-row partial sums (k = kh*3 + kw; kh: 0->dh=-1, 1->0, 2->+1).
    p_up  = tap(xl, -1, -1) * wk(0) + tap(x, -1, 0) * wk(1) + tap(xr, -1, 1) * wk(2)
    p_mid = tap(xl,  0, -1) * wk(3) + x            * wk(4) + tap(xr,  0, 1) * wk(5)
    p_dn  = tap(xl,  1, -1) * wk(6) + tap(x,  1, 0) * wk(7) + tap(xr,  1, 1) * wk(8)

    # Row masks zero the contributions that wrapped across the top/bottom edge.
    out = p_mid + p_up * rmask_t + p_dn * rmask_b + b
    o_ref[0] = out.astype(o_ref.dtype)


def _pick_channel_tile(C, HW, budget_bytes=1 * 1024 * 1024):
    """Largest channel tile TC with C % TC == 0, (TC % 8 == 0 or TC == C),
    and TC * HW * 4 <= budget — keeps the per-step VMEM footprint small
    (double-buffered in/out blocks + f32 temporaries) on v5e/v6e/v7x."""
    max_tc = max(1, budget_bytes // (HW * 4))
    if C <= max_tc:
        return C
    tc = (max_tc // 8) * 8
    while tc >= 8:
        if C % tc == 0:
            return tc
        tc -= 8
    return C  # fallback: no multiple-of-8 divisor fits; take the full channel dim


def dwconv(x_nchw, weight, bias):
    """Depthwise 3x3 convolution, stride 1, padding 1, groups=C (PyTorch DWConv).

    x_nchw : (N, C, H, W)
    weight : (C, 1, 3, 3)   PyTorch depthwise layout
    bias   : (C,)
    returns (N, C, H, W)
    """
    N, C, H, W = x_nchw.shape
    HW = H * W

    # Contiguous reshapes only — no transpose / pad passes over HBM.
    x_flat = x_nchw.reshape(N, C, HW)
    w_c9 = weight.reshape(C, 9)                 # (C, 9), k = kh*3 + kw
    b_c1 = bias.reshape(C, 1)

    # Precomputed border masks (tiny; avoids per-tap compares in the kernel).
    idx = jnp.arange(HW, dtype=jnp.int32)
    col = idx % W
    masks = jnp.stack(
        [
            (col <= W - 2).astype(jnp.float32),        # dw = -1 source pre-mask
            (col >= 1).astype(jnp.float32),            # dw = +1 source pre-mask
            (idx >= W).astype(jnp.float32),            # dh = -1 output row mask
            (idx < (H - 1) * W).astype(jnp.float32),   # dh = +1 output row mask
        ],
        axis=0,
    )                                                  # (4, HW)

    TC = _pick_channel_tile(C, HW)
    grid = (N, C // TC)

    itemsize = jnp.dtype(x_nchw.dtype).itemsize
    cost = pl.CostEstimate(
        flops=2 * 9 * N * C * HW + N * C * HW,
        transcendentals=0,
        bytes_accessed=(2 * N * C * HW * itemsize   # x in + out
                        + C * 9 * itemsize          # weights
                        + C * itemsize              # bias
                        + 4 * HW * 4),              # border masks
    )

    out = pl.pallas_call(
        functools.partial(_dwconv3x3_kernel, H=H, W=W),
        out_shape=jax.ShapeDtypeStruct((N, C, HW), x_nchw.dtype),
        grid_spec=pltpu.PrefetchScalarGridSpec(
            num_scalar_prefetch=0,
            grid=grid,
            in_specs=[
                pl.BlockSpec((1, TC, HW), lambda n, c: (n, c, 0)),  # x
                pl.BlockSpec((TC, 9), lambda n, c: (c, 0)),         # weights
                pl.BlockSpec((TC, 1), lambda n, c: (c, 0)),         # bias
                pl.BlockSpec((4, HW), lambda n, c: (0, 0)),         # border masks
            ],
            out_specs=pl.BlockSpec((1, TC, HW), lambda n, c: (n, c, 0)),
        ),
        compiler_params=pltpu.CompilerParams(
            dimension_semantics=("parallel", "parallel"),
            vmem_limit_bytes=48 * 1024 * 1024,
        ),
        cost_estimate=cost,
    )(x_flat, w_c9, b_c1, masks)

    return out.reshape(N, C, H, W)


def dwconv_reference(x_nchw, weight, bias):
    """Pure-JAX reference: grouped conv via lax.conv_general_dilated."""
    C = x_nchw.shape[1]
    out = jax.lax.conv_general_dilated(
        x_nchw, weight,
        window_strides=(1, 1),
        padding=((1, 1), (1, 1)),
        dimension_numbers=("NCHW", "OIHW", "NCHW"),
        feature_group_count=C,
    )
    return out + bias.reshape(1, C, 1, 1)


if __name__ == "__main__":
    key = jax.random.PRNGKey(0)
    k_x, k_w, k_b = jax.random.split(key, 3)

    N, C, H, W = 2, 4, 16, 16  # DWConv(dim=C)
    x = jax.random.normal(k_x, (N, C, H, W), dtype=jnp.float32)
    # Deterministic synthetic parameters (shapes match nn.Conv2d(C, C, 3, 1, 1, groups=C)).
    weight = jax.random.normal(k_w, (C, 1, 3, 3), dtype=jnp.float32) * 0.1
    bias = jax.random.normal(k_b, (C,), dtype=jnp.float32) * 0.1

    out = dwconv(x, weight, bias)
    out = jax.block_until_ready(out)

    ref = dwconv_reference(x, weight, bias)
    assert out.shape == (N, C, H, W)
    assert jnp.allclose(out, ref, atol=1e-5, rtol=1e-5)

    print("KERNEL_OK")
</pallas_src>

<mosaic_0001>
module attributes {stable_mosaic.version = 11 : i64} {
  func.func @_dwconv3x3_kernel(%arg0: i32, %arg1: i32, %arg2: memref<1x4x256xf32, #tpu.memory_space<vmem>>, %arg3: memref<4x9xf32, #tpu.memory_space<vmem>>, %arg4: memref<4x1xf32, #tpu.memory_space<vmem>>, %arg5: memref<4x256xf32, #tpu.memory_space<vmem>>, %arg6: memref<1x4x256xf32, #tpu.memory_space<vmem>>) attributes {dimension_semantics = [#tpu.dimension_semantics<parallel>, #tpu.dimension_semantics<parallel>], iteration_bounds = array<i64: 2, 1>, scalar_prefetch = 0 : i64, scratch_operands = 0 : i64, tpu.core_type = #tpu.core_type<tc>, window_params = [{transform_indices = @transform_0, window_bounds = array<i64: 1, 4, 256>}, {transform_indices = @transform_1, window_bounds = array<i64: 4, 9>}, {transform_indices = @transform_2, window_bounds = array<i64: 4, 1>}, {pipeline_mode = #tpu.pipeline_mode<synchronous>, transform_indices = @transform_3, window_bounds = array<i64: 4, 256>}, {transform_indices = @transform_4, window_bounds = array<i64: 1, 4, 256>}]} {
    %c0 = arith.constant 0 : index
    %c0_0 = arith.constant 0 : index
    %c0_1 = arith.constant 0 : index
    %0 = vector.load %arg2[%c0, %c0_0, %c0_1] : memref<1x4x256xf32, #tpu.memory_space<vmem>>, vector<1x4x256xf32>
    %1 = vector.shape_cast %0 : vector<1x4x256xf32> to vector<4x256xf32>
    %c0_2 = arith.constant 0 : index
    %c0_3 = arith.constant 0 : index
    %2 = vector.load %arg3[%c0_2, %c0_3] : memref<4x9xf32, #tpu.memory_space<vmem>>, vector<4x9xf32>
    %c0_4 = arith.constant 0 : index
    %c0_5 = arith.constant 0 : index
    %3 = vector.load %arg4[%c0_4, %c0_5] : memref<4x1xf32, #tpu.memory_space<vmem>>, vector<4x1xf32>
    %c0_6 = arith.constant 0 : index
    %c0_7 = arith.constant 0 : index
    %4 = vector.load %arg5[%c0_6, %c0_7] : memref<4x256xf32, #tpu.memory_space<vmem>>, vector<1x256xf32>
    %c1 = arith.constant 1 : index
    %c0_8 = arith.constant 0 : index
    %5 = vector.load %arg5[%c1, %c0_8] : memref<4x256xf32, #tpu.memory_space<vmem>>, vector<1x256xf32>
    %c2 = arith.constant 2 : index
    %c0_9 = arith.constant 0 : index
    %6 = vector.load %arg5[%c2, %c0_9] : memref<4x256xf32, #tpu.memory_space<vmem>>, vector<1x256xf32>
    %c3 = arith.constant 3 : index
    %c0_10 = arith.constant 0 : index
    %7 = vector.load %arg5[%c3, %c0_10] : memref<4x256xf32, #tpu.memory_space<vmem>>, vector<1x256xf32>
    %8 = vector.broadcast %4 : vector<1x256xf32> to vector<4x256xf32>
    %9 = arith.mulf %1, %8 : vector<4x256xf32>
    %10 = vector.broadcast %5 : vector<1x256xf32> to vector<4x256xf32>
    %11 = arith.mulf %1, %10 : vector<4x256xf32>
    %c17_i32 = arith.constant 17 : i32
    %12 = tpu.dynamic_rotate %9 by %c17_i32 dim 1 : vector<4x256xf32>, i32 -> vector<4x256xf32>
    %13 = vector.extract_strided_slice %2 {offsets = [0, 0], sizes = [4, 1], strides = [1, 1]} : vector<4x9xf32> to vector<4x1xf32>
    %14 = vector.broadcast %13 : vector<4x1xf32> to vector<4x256xf32>
    %15 = arith.mulf %12, %14 : vector<4x256xf32>
    %c16_i32 = arith.constant 16 : i32
    %16 = tpu.dynamic_rotate %1 by %c16_i32 dim 1 : vector<4x256xf32>, i32 -> vector<4x256xf32>
    %17 = vector.extract_strided_slice %2 {offsets = [0, 1], sizes = [4, 1], strides = [1, 1]} : vector<4x9xf32> to vector<4x1xf32>
    %18 = vector.broadcast %17 : vector<4x1xf32> to vector<4x256xf32>
    %19 = arith.mulf %16, %18 : vector<4x256xf32>
    %20 = arith.addf %15, %19 : vector<4x256xf32>
    %c15_i32 = arith.constant 15 : i32
    %21 = tpu.dynamic_rotate %11 by %c15_i32 dim 1 : vector<4x256xf32>, i32 -> vector<4x256xf32>
    %22 = vector.extract_strided_slice %2 {offsets = [0, 2], sizes = [4, 1], strides = [1, 1]} : vector<4x9xf32> to vector<4x1xf32>
    %23 = vector.broadcast %22 : vector<4x1xf32> to vector<4x256xf32>
    %24 = arith.mulf %21, %23 : vector<4x256xf32>
    %25 = arith.addf %20, %24 : vector<4x256xf32>
    %c1_i32 = arith.constant 1 : i32
    %26 = tpu.dynamic_rotate %9 by %c1_i32 dim 1 : vector<4x256xf32>, i32 -> vector<4x256xf32>
    %27 = vector.extract_strided_slice %2 {offsets = [0, 3], sizes = [4, 1], strides = [1, 1]} : vector<4x9xf32> to vector<4x1xf32>
    %28 = vector.broadcast %27 : vector<4x1xf32> to vector<4x256xf32>
    %29 = arith.mulf %26, %28 : vector<4x256xf32>
    %30 = vector.extract_strided_slice %2 {offsets = [0, 4], sizes = [4, 1], strides = [1, 1]} : vector<4x9xf32> to vector<4x1xf32>
    %31 = vector.broadcast %30 : vector<4x1xf32> to vector<4x256xf32>
    %32 = arith.mulf %1, %31 : vector<4x256xf32>
    %33 = arith.addf %29, %32 : vector<4x256xf32>
    %c255_i32 = arith.constant 255 : i32
    %34 = tpu.dynamic_rotate %11 by %c255_i32 dim 1 : vector<4x256xf32>, i32 -> vector<4x256xf32>
    %35 = vector.extract_strided_slice %2 {offsets = [0, 5], sizes = [4, 1], strides = [1, 1]} : vector<4x9xf32> to vector<4x1xf32>
    %36 = vector.broadcast %35 : vector<4x1xf32> to vector<4x256xf32>
    %37 = arith.mulf %34, %36 : vector<4x256xf32>
    %38 = arith.addf %33, %37 : vector<4x256xf32>
    %c241_i32 = arith.constant 241 : i32
    %39 = tpu.dynamic_rotate %9 by %c241_i32 dim 1 : vector<4x256xf32>, i32 -> vector<4x256xf32>
    %40 = vector.extract_strided_slice %2 {offsets = [0, 6], sizes = [4, 1], strides = [1, 1]} : vector<4x9xf32> to vector<4x1xf32>
    %41 = vector.broadcast %40 : vector<4x1xf32> to vector<4x256xf32>
    %42 = arith.mulf %39, %41 : vector<4x256xf32>
    %c240_i32 = arith.constant 240 : i32
    %43 = tpu.dynamic_rotate %1 by %c240_i32 dim 1 : vector<4x256xf32>, i32 -> vector<4x256xf32>
    %44 = vector.extract_strided_slice %2 {offsets = [0, 7], sizes = [4, 1], strides = [1, 1]} : vector<4x9xf32> to vector<4x1xf32>
    %45 = vector.broadcast %44 : vector<4x1xf32> to vector<4x256xf32>
    %46 = arith.mulf %43, %45 : vector<4x256xf32>
    %47 = arith.addf %42, %46 : vector<4x256xf32>
    %c239_i32 = arith.constant 239 : i32
    %48 = tpu.dynamic_rotate %11 by %c239_i32 dim 1 : vector<4x256xf32>, i32 -> vector<4x256xf32>
    %49 = vector.extract_strided_slice %2 {offsets = [0, 8], sizes = [4, 1], strides = [1, 1]} : vector<4x9xf32> to vector<4x1xf32>
    %50 = vector.broadcast %49 : vector<4x1xf32> to vector<4x256xf32>
    %51 = arith.mulf %48, %50 : vector<4x256xf32>
    %52 = arith.addf %47, %51 : vector<4x256xf32>
    %53 = vector.broadcast %6 : vector<1x256xf32> to vector<4x256xf32>
    %54 = arith.mulf %25, %53 : vector<4x256xf32>
    %55 = arith.addf %38, %54 : vector<4x256xf32>
    %56 = vector.broadcast %7 : vector<1x256xf32> to vector<4x256xf32>
    %57 = arith.mulf %52, %56 : vector<4x256xf32>
    %58 = arith.addf %55, %57 : vector<4x256xf32>
    %59 = vector.broadcast %3 : vector<4x1xf32> to vector<4x256xf32>
    %60 = arith.addf %58, %59 : vector<4x256xf32>
    %c0_11 = arith.constant 0 : index
    %c0_12 = arith.constant 0 : index
    %c0_13 = arith.constant 0 : index
    %61 = vector.load %arg6[%c0_11, %c0_12, %c0_13] : memref<1x4x256xf32, #tpu.memory_space<vmem>>, vector<1x4x256xf32>
    %62 = vector.shape_cast %61 : vector<1x4x256xf32> to vector<4x256xf32>
    %63 = vector.shape_cast %60 : vector<4x256xf32> to vector<1x4x256xf32>
    tpu.vector_store %arg6[%c0_11, %c0_12, %c0_13], %63 {strides = array<i32>} : memref<1x4x256xf32, #tpu.memory_space<vmem>>, vector<1x4x256xf32>,
    return
  }
  func.func @transform_0(%arg0: i32, %arg1: i32) -> (i32, i32, i32) {
    %c0_i32 = arith.constant 0 : i32
    %c0_i32_0 = arith.constant 0 : i32
    return %arg0, %arg1, %c0_i32 : i32, i32, i32
  }
  func.func @transform_1(%arg0: i32, %arg1: i32) -> (i32, i32) {
    %c0_i32 = arith.constant 0 : i32
    %c0_i32_0 = arith.constant 0 : i32
    return %arg1, %c0_i32 : i32, i32
  }
  func.func @transform_2(%arg0: i32, %arg1: i32) -> (i32, i32) {
    %c0_i32 = arith.constant 0 : i32
    %c0_i32_0 = arith.constant 0 : i32
    return %arg1, %c0_i32 : i32, i32
  }
  func.func @transform_3(%arg0: i32, %arg1: i32) -> (i32, i32) {
    %c0_i32 = arith.constant 0 : i32
    %c0_i32_0 = arith.constant 0 : i32
    %c0_i32_1 = arith.constant 0 : i32
    return %c0_i32, %c0_i32_0 : i32, i32
  }
  func.func @transform_4(%arg0: i32, %arg1: i32) -> (i32, i32, i32) {
    %c0_i32 = arith.constant 0 : i32
    %c0_i32_0 = arith.constant 0 : i32
    return %arg0, %arg1, %c0_i32 : i32, i32, i32
  }
}

</mosaic_0001>

<bundles_post_ra>
// kernel: tpu_custom_call.1
= control target key start
LH: loop header
LB: loop body
LE: loop exit
PB: predicated region body
PF: predicated region fallthrough
CT: control target
= control target key end

     0   :  { %9 = vsyncpa [#allocation3], 0  ;;  %s1156_s0 = inlined_call_operand.hbm [shape: f32[2,4,256], index: 0, kind: input, shape index: {}]   ;;  %s1157_s1 = inlined_call_operand.hbm [shape: f32[4,9], index: 1, kind: input, shape index: {}]   ;;  %s1158_s2 = inlined_call_operand.vmem [shape: f32[4,1], index: 2, kind: input, shape index: {}]   ;;  %s1159_s3 = inlined_call_operand.vmem [shape: f32[4,256], index: 3, kind: input, shape index: {}]   ;;  %s1160_s4 = inlined_call_operand.hbm [shape: f32[2,4,256], index: 4, kind: output, shape index: {}]  }
   0x1   :  { %11 = vsyncpa [#allocation3 + $0x1], 0 }
   0x2   :  { %12 = vsyncpa [#allocation6], 0 }
   0x3   :  { %13 = vsyncpa [#allocation4], 0 }
   0x4   :  { %15 = vsyncpa [#allocation4 + $0x1], 0  ;;  %s926_s15 = smov 0   ;;  %s928_s16 = smov 0  }
   0x5   :  { %s930_s17 = smov 0   ;;  %s932_s18 = smov 0  }
   0x6   :  { %s934_s19 = smov 0   ;;  %s936_s20 = smov 0  }
   0x7 LB: > { %s616_s21 = sadd.s32 4294967295, %s878_s20   ;;  %s617_s22 = sadd.s32 4294967294, %s878_s20   ;;  %s878_s20 = sphi %s936_s20, %s21_s20   ;;  %s874_s19 = sphi %s934_s19, %s1177_s19   ;;  %s870_s18 = sphi %s932_s18, %s1176_s18   ;;  %s866_s17 = sphi %s930_s17, %s1175_s17   ;;  %s862_s16 = sphi %s928_s16, %s1174_s16   ;;  %s858_s15 = sphi %s926_s15, %s1173_s15  }
   0x8   : > { %p55_p0 = scmp.ne.s32.totalorder %s862_s16, %s858_s15  ;;  %p960_p1 = scmp.eq.s32.totalorder %s616_s21, 0 }
   0x9   : > { %p964_p2 = scmp.eq.s32.totalorder %s616_s21, 1  ;;  %p160_p3 = scmp.eq.s32.totalorder %s617_s22, 1 }
   0xa   : > { %p970_p4 = por %p960_p1, %p55_p0  ;;  %p618_p5 = scmp.ge.s32.totalorder %s878_s20, 1 }
   0xb   : > { %p975_p6 = por %p160_p3, %p55_p0  ;;  %p167_p7 = scmp.lt.s32.totalorder %s878_s20, 3 }
   0xc   : > { %s1164_s25 = scalar_select %p970_p4, 1, 0 }
   0xd   : > { %s1165_s26 = scalar_select %p975_p6, 1, 0 }
   0xe   : > { %p980_p8 = pnand %p618_p5, %p167_p7  ;;  %s880_s28 = smov [#allocation5]  }
   0xf   : > { %s182_s29 = sshll.u32 %s880_s28, 4  ;;  %s33_s5 = sadd.s32 1, %s874_s19  ;;  %s183_s29 = int_to_ptr.vmem [resolvable:$true] %s182_s29 }
  0x10   : > { %p647_p10 = pneg %p980_p8  ;;  %s42_s6 = sadd.s32 1, %s866_s17 }
  0x11   : > { %p35_p12 = scmp.ge.s32.totalorder %s33_s5, 2  ;;  %s751_s7 = scalar_lea.vmem %s183_s29, 64 }
  0x12   : > { %p989_p11 = pnand %p647_p10, %p960_p1  ;;  %p752_p0 = scmp.ne.s32.totalorder %s183_s29, %s751_s7 }
  0x13   : > { %p759_p7 = scmp.lt.s32.totalorder %s183_s29, %s183_s29  ;;  %p760_p6 = scmp.lt.s32.totalorder %s751_s7, %s751_s7 }
  0x14   : > { %p742_p13 = pneg %p989_p11 }
  0x15   : > { %p761_p9 = por %p760_p6, %p759_p7 }
  0x16   : > { %p754_p3 = pnand %p752_p0, %p742_p13 }
  0x18   : > { %p755_p5 = pneg %p754_p3 }
  0x1a   : > { %p762_p4 = pnand %p761_p9, %p755_p5 }
  0x1c   : > { %765 = shalt.err (!%p762_p4)
}
  0x1d   : > { %650 = dma.hbm_to_vmem [thread:$0]  (!%p989_p11), %s1157_s1, 64, %s183_s29, [#allocation6]  }
  0x1e   : > { %s1179_s5 = smov (%p35_p12, %s33_s5), 0  ;;  %p49_p6 = scmp.ne.s32.totalorder %s866_s17, %s862_s16 }
  0x1f   : > { %p50_p4 = scmp.eq.s32.totalorder %s878_s20, 0  ;;  %s37_s10 = ssub.s32 %s874_s19, %s1179_s5 }
  0x20   : > { %p660_p9 = scmp.lt.s32.totalorder %s878_s20, 2  ;;  %p40_p10 = scmp.eq.s32.totalorder %s37_s10, 0 }
  0x21   : > { %p51_p13 = por %p50_p4, %p49_p6  ;;  %p1012_p0 = por %p964_p2, %p49_p6 }
  0x22   : > { %s203_s12 = sand.u32 1, %s866_s17   ;;  %s637_s21 = sshll.u32 %s874_s19, 7 }
  0x23   : > { %s1018_s13 = scalar_select %p40_p10, %s866_s17, %s42_s6  }
  0x24   : > { %s622_s14 = sshll.u32 %s203_s12, 3  ;;  %s215_s29 = scalar_lea.hbm %s1156_s0, %s637_s21 }
  0x25   : > { %s207_s30 = scalar_lea.vmem [#allocation2], %s622_s14  ;;  %p1024_p11 = pnand %p660_p9, %p51_p13 }
  0x26   : > { %s217_s7 = sshll.u32 %s207_s30, 4  ;;  %s204_s24 = scalar_lea.sflag [#allocation3], %s203_s12  ;;  %s218_s7 = int_to_ptr.vmem [resolvable:$true] %s217_s7 }
  0x27   : > { %p768_p2 = pneg %p1024_p11  ;;  %s779_s9 = scalar_lea.vmem %s218_s7, 128 }
  0x28   : > { %p780_p12 = scmp.ne.s32.totalorder %s218_s7, %s779_s9  ;;  %s881_s6 = smov [#allocation2]  }
  0x29   : > { %s784_s10 = sshll.u32 %s881_s6, 4  ;;  %s785_s10 = int_to_ptr.vmem [resolvable:$false] %s784_s10 }
  0x2a   : > { %p782_p3 = pnand %p780_p12, %p768_p2  ;;  %s786_s22 = scalar_lea.vmem %s785_s10, 256 }
  0x2b   : > { %p787_p7 = scmp.lt.s32.totalorder %s218_s7, %s785_s10  ;;  %p788_p6 = scmp.lt.s32.totalorder %s786_s22, %s779_s9 }
  0x2c   : > { %p783_p5 = pneg %p782_p3 }
  0x2d   : > { %p789_p4 = por %p788_p6, %p787_p7 }
  0x2f   : > { %p790_p10 = pnand %p789_p4, %p783_p5 }
  0x31   : > { %793 = shalt.err (!%p790_p10)
}
  0x32   : > { %654 = dma.hbm_to_vmem [thread:$0]  (!%p1024_p11), %s215_s29, 128, %s218_s7, %s204_s24  }
  0x33   : > { %226 = sbr.rel (%p980_p8) target bundleno = 266 (0x10a), region = 36  ;;  %s1035_s12 = sand.u32 (!%p980_p8), 1, %s862_s16  }
  0x34   : > { %s626_s14 = sshll.u32 (!%p980_p8), %s1035_s12, 3  ;;  %s229_s21 = scalar_lea.sflag (!%p980_p8), [#allocation3], %s1035_s12 }
  0x35   : > { %s232_s28 = scalar_lea.vmem (!%p980_p8), [#allocation2], %s626_s14  ;;  %p1170_p9 = scmp.ne.s32.totalorder (!%p980_p8), %s1164_s25, 0 }
  0x38   : > { %845 = dma.done.wait (%p1170_p9), %s229_s21, 128  }
  0x39   : > { %847 = vsyncadd (%p1170_p9), %s229_s21, 4294967168 }
  0x3a   : > { %849 = dma.done.wait (%p960_p1), [#allocation6], 64  }
  0x3b   : > { %851 = vsyncadd (%p960_p1), [#allocation6], 4294967232  ;;  %v882_v0 = vmov 4   ;;  %v883_v1 = vmov 1   ;;  %v280_v2 = vlaneseq  ;;  %v270_v6 = vld [vmem:[#allocation5] sm:$0xf] }
  0x3c   : > { %730 = vset.pattern.permute.xlu0 %v882_v0  ;;  %731 = vset.pattern.permute.xlu1 %v883_v1  ;;  %v272_v7 = vld [vmem:[%s1159_s3] ss:$4 sm:$0x3]  ;;  %v884_v12 = vmov 2   ;;  %v885_v13 = vmov 6   ;;  %v886_v16 = vmov 3  }
  0x3d   : > { %v1050_v3 = vshrl.u32 %v280_v2, 7  ;;  %333 = vperm.xlu1 %731, %v270_v6   ;;  %372 = vperm.xlu0 %730, %v270_v6   ;;  %v1063_v10 = vld [vmem:[%s232_s28] sm:$0xff]  ;;  %s887_s23 = smov 16   ;;  %v888_v18 = vmov 8   ;;  %s889_s29 = smov 17   ;;  %v890_v19 = vmov 7  }
  0x3e   : > { %v323_v14 = vcombine.high %v1063_v10, %v1063_v10  ;;  %v629_v20 = vld [vmem:[%s1159_s3 + $0x1] ss:$4 sm:$0x3]  ;;  %v891_v21 = vmov 5   ;;  %v892_v22 = vmov 0   ;;  %s893_s8 = smov 1  }
  0x3f   : > { %v1053_v4 = vsub.s32 0, %v1050_v3  ;;  %v1056_v5 = vsub.s32 1, %v1050_v3  ;;  %s894_s24 = smov 113   ;;  %s895_s9 = smov 15   ;;  %v271_v28 = vld [vmem:[%s1158_s2] sm:$0xf] }
  0x40   : > { %s896_s6 = smov 112   ;;  %s897_s10 = smov 127   ;;  %v899_v39 = vmov 839922192   ;;  %v1086_v43 = vand.u32 127, %v280_v2 }
  0x41   : > { %v283_v8 = vrot.slane %v272_v7, %v1053_v4  ;;  %v287_v9 = vrot.slane %v272_v7, %v1056_v5  ;;  %732 = vset.pattern.permute.xlu1 %v884_v12  ;;  %734 = vset.pattern.permute.xlu0 %v885_v13  ;;  %v295_v23 = vrot.slane %v629_v20, %v1053_v4  ;;  %s898_s22 = smov 111   ;;  %v375_v40 = vunpack.c.l.s4 %v899_v39  ;;  %v630_v52 = vld [vmem:[%s1159_s3 + $0x2] ss:$4 sm:$0x3]  ;;  %s638_s30 = sshll.u32 %s870_s18, 7 }
  0x42   : > { %351 = vperm.xlu1 %732, %v270_v6   ;;  %411 = vperm.xlu0 %734, %v270_v6   ;;  %v299_v24 = vrot.slane %v629_v20, %v1056_v5  ;;  %vm329_vm0 = vcmp.lt.s32.totalorder %v1086_v43, 16  ;;  %vm312_vm1 = vcmp.lt.s32.totalorder %v1086_v43, 17  ;;  %vm347_vm2 = vcmp.lt.s32.totalorder %v1086_v43, 15  ;;  %s264_s7 = scalar_lea.vmem [#allocation7], %s626_s14  ;;  %s900_s21 = smov [#allocation7]  }
  0x43   : > { %v288_v11 = vcombine.low %v283_v8, %v287_v9  ;;  %v376_v42 = vunpack.c.0.s8 %v375_v40  ;;  %v450_v59 = vrot.slane %v630_v52, %v1053_v4  ;;  %v454_v60 = vrot.slane %v630_v52, %v1056_v5  ;;  %s798_s18 = sshll.u32 %s900_s21, 4  ;;  %s799_s18 = int_to_ptr.vmem [resolvable:$false] %s798_s18 }
  0x44   : > { %v300_v25 = vcombine.low %v295_v23, %v299_v24  ;;  %vm362_vm3 = vcmp.lt.s32.totalorder %v1086_v43, 1  ;;  %vm420_vm4 = vcmp.lt.s32.totalorder %v1086_v43, 112  ;;  %vm407_vm5 = vcmp.lt.s32.totalorder %v1086_v43, 113  ;;  %s800_s14 = scalar_lea.vmem %s799_s18, 256 }
  0x45   : > { %v290_v15 = vmul.f32 %v288_v11, %v1063_v10  ;;  %v379_v46 = vsub.s32 %v376_v42, %v1050_v3  ;;  %vm392_vm6 = vcmp.lt.s32.totalorder %v1086_v43, 127  ;;  %vm435_vm7 = vcmp.lt.s32.totalorder %v1086_v43, 111 }
  0x46   : > { %733 = vset.pattern.permute.xlu1 %v886_v16  ;;  %327 = vrot.lane.b32.xlu0 %v323_v14, %s887_s23  ;;  %v302_v26 = vmul.f32 %v300_v25, %v1063_v10 }
  0x47   : > { %v304_v17 = vcombine.high %v290_v15, %v290_v15  ;;  %366 = vperm.xlu1 %733, %v270_v6   ;;  %737 = vset.pattern.permute.xlu0 %v888_v18 }
  0x48   : > { %v341_v27 = vcombine.high %v302_v26, %v302_v26 }
  0x4a   : > { %308 = vrot.lane.b32.xlu0 %v304_v17, %s889_s29 }
  0x4b   : > { %735 = vset.pattern.permute.xlu1 %v890_v19 }
  0x4c   : > { %424 = vperm.xlu1 %735, %v270_v6  }
  0x4e   : > { %439 = vperm.xlu0 %737, %v270_v6  }
  0x50   : > { %306 = vrot.lane.b32.xlu1 %v290_v15, %s889_s29 }
  0x51   : > { %736 = vset.pattern.permute.xlu1 %v891_v21 }
  0x52   : > { %738 = vset.pattern.permute.xlu0 %v892_v22 }
  0x53   : > { %317 = vperm.xlu0 %738, %v270_v6  }
  0x54   : > { %325 = vrot.lane.b32.xlu1 %v1063_v10, %s887_s23 }
  0x57   : > { %358 = vrot.lane.b32.xlu0 %v290_v15, %s893_s8 }
  0x58   : > { %396 = vperm.xlu1 %736, %v270_v6  }
  0x5b   : > { %403 = vrot.lane.b32.xlu0 %v290_v15, %s894_s24 }
  0x5c   : > { %343 = vrot.lane.b32.xlu1 %v302_v26, %s895_s9 }
  0x5f   : > { %416 = vrot.lane.b32.xlu0 %v1063_v10, %s896_s6 }
  0x60   : > { %345 = vrot.lane.b32.xlu1 %v341_v27, %s895_s9 }
  0x63   : > { %388 = vrot.lane.b32.xlu0 %v302_v26, %s897_s10 }
  0x64   : > { %360 = vrot.lane.b32.xlu1 %v304_v17, %s893_s8  ;;  %s505_s8 = sshll.u32 %s264_s7, 4  ;;  %s506_s8 = int_to_ptr.vmem [resolvable:$true] %s505_s8 }
  0x65   : > { %p801_p11 = scmp.lt.s32.totalorder %s506_s8, %s799_s18 }
  0x67   : > { %431 = vrot.lane.b32.xlu0 %v302_v26, %s898_s22 }
  0x68   : > { %405 = vrot.lane.b32.xlu1 %v304_v17, %s894_s24 }
  0x6b   : > { %478 = vperm.xlu0 %738, %v271_v28  }
  0x6c   : > { %418 = vrot.lane.b32.xlu1 %v323_v14, %s896_s6  ;;  %s503_s6 = scalar_lea.hbm %s1160_s4, %s638_s30 }
  0x70   : > { %390 = vrot.lane.b32.xlu1 %v341_v27, %s897_s10  ;;  %s489_s10 = scalar_lea.sflag [#allocation4], %s1035_s12 }
  0x74   : > { %433 = vrot.lane.b32.xlu1 %v341_v27, %s898_s22  ;;  %s794_s22 = scalar_lea.vmem %s506_s8, 128 }
  0x75   : > { %p795_p1 = scmp.ne.s32.totalorder %s506_s8, %s794_s22  ;;  %p802_p2 = scmp.lt.s32.totalorder %s800_s14, %s794_s22 }
  0x77   : > { %p796_p8 = pnand %p795_p1, %p1012_p0  ;;  %p803_p12 = por %p802_p2, %p801_p11 }
  0x79   : > { %p797_p13 = pneg %p796_p8 }
  0x7b   : > { %p804_p3 = pnand %p803_p12, %p797_p13 }
  0xb8   : > { %v334_v29 = vpop.permute.xlu1 %333  ;;  %v373_v30 = vpop.permute.xlu0 %372 }
  0xb9   : > { %v380_v51 = vrot.slane %v373_v30, %v379_v46 }
  0xbb   : > { %v382_v62 = vmul.f32 %v380_v51, %v1063_v10 }
  0xbd   : > { %v352_v31 = vpop.permute.xlu1 %351  ;;  %v1079_v32 = vpop.permute.xlu0 %411  ;;  %v384_v12 = vcombine.high %v382_v62, %v382_v62 }
  0xc1   : > { %v328_v33 = vpop.permute.xlu0 %327 }
  0xc2   : > { %v367_v34 = vpop.permute.xlu1 %366 }
  0xc5   : > { %v309_v35 = vpop.permute.xlu0 %308 }
  0xc7   : > { %v1081_v36 = vpop.permute.xlu1 %424 }
  0xc9   : > { %v1083_v37 = vpop.permute.xlu0 %439 }
  0xcb   : > { %v307_v38 = vpop.permute.xlu1 %306 }
  0xcc   : > { %v313_v55 = vsel %vm312_vm1, %v307_v38, %v309_v35  ;;  %v314_v56 = vsel %vm312_vm1, %v309_v35, %v307_v38 }
  0xce   : > { %v318_v44 = vpop.permute.xlu0 %317 }
  0xcf   : > { %v326_v41 = vpop.permute.xlu1 %325  ;;  %v320_v57 = vmul.f32 %v318_v44, %v314_v56  ;;  %v321_v58 = vmul.f32 %v318_v44, %v313_v55 }
  0xd0   : > { %v330_v47 = vsel %vm329_vm0, %v326_v41, %v328_v33  ;;  %v331_v48 = vsel %vm329_vm0, %v328_v33, %v326_v41 }
  0xd1   : > { %v336_v53 = vmul.f32 %v334_v29, %v331_v48  ;;  %v337_v54 = vmul.f32 %v334_v29, %v330_v47 }
  0xd2   : > { %v359_v49 = vpop.permute.xlu0 %358 }
  0xd3   : > { %v397_v45 = vpop.permute.xlu1 %396  ;;  %v338_v1 = vadd.f32 %v336_v53, %v320_v57  ;;  %v339_v2 = vadd.f32 %v337_v54, %v321_v58 }
  0xd6   : > { %v404_v3 = vpop.permute.xlu0 %403 }
  0xd7   : > { %v344_v50 = vpop.permute.xlu1 %343 }
  0xda   : > { %v417_v10 = vpop.permute.xlu0 %416 }
  0xdb   : > { %v346_v61 = vpop.permute.xlu1 %345 }
  0xdc   : > { %v348_v63 = vsel %vm347_vm2, %v344_v50, %v346_v61  ;;  %v349_v0 = vsel %vm347_vm2, %v346_v61, %v344_v50 }
  0xdd   : > { %v354_v6 = vmul.f32 %v352_v31, %v349_v0  ;;  %v355_v7 = vmul.f32 %v352_v31, %v348_v63 }
  0xde   : > { %v389_v23 = vpop.permute.xlu0 %388 }
  0xdf   : > { %v356_v8 = vadd.f32 %v354_v6, %v338_v1  ;;  %v357_v9 = vadd.f32 %v355_v7, %v339_v2  ;;  %v361_v11 = vpop.permute.xlu1 %360 }
  0xe0   : > { %v363_v13 = vsel %vm362_vm3, %v359_v49, %v361_v11  ;;  %v364_v14 = vsel %vm362_vm3, %v361_v11, %v359_v49 }
  0xe1   : > { %v457_v15 = vmul.f32 %v450_v59, %v356_v8  ;;  %v458_v16 = vmul.f32 %v454_v60, %v357_v9  ;;  %v369_v17 = vmul.f32 %v367_v34, %v364_v14  ;;  %v370_v18 = vmul.f32 %v367_v34, %v363_v13  ;;  %v631_v34 = vld [vmem:[%s1159_s3 + $0x3] ss:$4 sm:$0x3] }
  0xe2   : > { %v432_v41 = vpop.permute.xlu0 %431  ;;  %v465_v46 = vrot.slane %v631_v34, %v1053_v4 }
  0xe3   : > { %v386_v19 = vadd.f32 %v382_v62, %v369_v17  ;;  %v387_v20 = vadd.f32 %v384_v12, %v370_v18  ;;  %v406_v21 = vpop.permute.xlu1 %405 }
  0xe4   : > { %v408_v26 = vsel %vm407_vm5, %v404_v3, %v406_v21  ;;  %v409_v27 = vsel %vm407_vm5, %v406_v21, %v404_v3 }
  0xe5   : > { %v414_v39 = vmul.f32 %v1079_v32, %v408_v26  ;;  %v415_v40 = vmul.f32 %v1079_v32, %v409_v27 }
  0xe6   : > { %v479_v57 = vpop.permute.xlu0 %478 }
  0xe7   : > { %v419_v22 = vpop.permute.xlu1 %418 }
  0xe8   : > { %v421_v24 = vsel %vm420_vm4, %v417_v10, %v419_v22  ;;  %v422_v25 = vsel %vm420_vm4, %v419_v22, %v417_v10 }
  0xe9   : > { %v427_v29 = vmul.f32 %v1081_v36, %v421_v24  ;;  %v428_v30 = vmul.f32 %v1081_v36, %v422_v25  ;;  %v469_v36 = vrot.slane %v631_v34, %v1056_v5 }
  0xeb   : > { %v391_v28 = vpop.permute.xlu1 %390  ;;  %v429_v48 = vadd.f32 %v427_v29, %v414_v39  ;;  %v430_v49 = vadd.f32 %v428_v30, %v415_v40 }
  0xec   : > { %v393_v31 = vsel %vm392_vm6, %v389_v23, %v391_v28  ;;  %v394_v33 = vsel %vm392_vm6, %v391_v28, %v389_v23 }
  0xed   : > { %v399_v35 = vmul.f32 %v397_v45, %v393_v31  ;;  %v400_v38 = vmul.f32 %v397_v45, %v394_v33 }
  0xef   : > { %v401_v42 = vadd.f32 %v399_v35, %v386_v19  ;;  %v402_v44 = vadd.f32 %v400_v38, %v387_v20  ;;  %v434_v47 = vpop.permute.xlu1 %433 }
  0xf0   : > { %v436_v50 = vsel %vm435_vm7, %v432_v41, %v434_v47  ;;  %v437_v45 = vsel %vm435_vm7, %v434_v47, %v432_v41 }
  0xf1   : > { %v459_v51 = vadd.f32 %v457_v15, %v401_v42  ;;  %v460_v43 = vadd.f32 %v458_v16, %v402_v44  ;;  %v442_v52 = vmul.f32 %v1083_v37, %v436_v50  ;;  %v443_v32 = vmul.f32 %v1083_v37, %v437_v45 }
  0xf3   : > { %v444_v53 = vadd.f32 %v442_v52, %v429_v48  ;;  %v445_v54 = vadd.f32 %v443_v32, %v430_v49 }
  0xf5   : > { %v472_v55 = vmul.f32 %v465_v46, %v444_v53  ;;  %v473_v4 = vmul.f32 %v469_v36, %v445_v54 }
  0xf7   : > { %v474_v5 = vadd.f32 %v472_v55, %v459_v51  ;;  %v475_v56 = vadd.f32 %v473_v4, %v460_v43 }
  0xf9   : > { %v481_v58 = vadd.f32 %v479_v57, %v474_v5  ;;  %v482_v59 = vadd.f32 %v479_v57, %v475_v56 }
  0xfb   : > { %v485_v60 = vcombine.low %v481_v58, %v482_v59 }
  0xfd   : > { %487 = vst [vmem:[%s264_s7] sm:$0xff] %v485_v60 }
  0xfe   : > { %807 = shalt.err (!%p804_p3)
}
  0xff   : > { %s808_s28 = scalar_lea.hbm %s503_s6, 128  ;;  %s812_s27 = scalar_lea.hbm %s1160_s4, 256 }
 0x100   : > { %p809_p5 = scmp.ne.s32.totalorder %s503_s6, %s808_s28  ;;  %p813_p4 = scmp.lt.s32.totalorder %s503_s6, %s1160_s4 }
 0x101   : > { %p814_p10 = scmp.lt.s32.totalorder %s812_s27, %s808_s28 }
 0x102   : > { %p810_p7 = pnand %p809_p5, %p1012_p0 }
 0x103   : > { %p815_p9 = por %p814_p10, %p813_p4 }
 0x104   : > { %p811_p6 = pneg %p810_p7 }
 0x106   : > { %p816_p1 = pnand %p815_p9, %p811_p6 }
 0x108   : > { %819 = shalt.err (!%p816_p1)
}
 0x109   : > { %645 = dma.vmem_to_hbm [thread:$0]  (%p1012_p0), %s506_s8, 128, %s503_s6, %s489_s10  }
 0x10a PF: > { %s517_s30 = sand.u32 1, %s858_s15   ;;  %p1171_p8 = scmp.ne.s32.totalorder %s1165_s26, 0 }
 0x10b   : > { %p1172_p13 = scmp.ge.s32.totalorder %s878_s20, 2  ;;  %s518_s7 = scalar_lea.sflag [#allocation4], %s517_s30 }
 0x10d   : > { %p656_p11 = pnand %p1172_p13, %p1171_p8 }
 0x10f   : > { %p657_p2 = pneg %p656_p11 }
 0x111   : > { %853 = dma.done.wait (%p657_p2), %s518_s7, 128  }
 0x112   : > { %855 = vsyncadd (%p657_p2), %s518_s7, 4294967168  ;;  %s21_s20 = sadd.s32 1, %s878_s20   ;;  %s1173_s15 = smov %s862_s16 }
 0x113   : > { %p18_p12 = scmp.ge.s32.totalorder %s21_s20, 4   ;;  %s1174_s16 = smov %s866_s17 }
 0x114   : > { %s1175_s17 = smov %s1018_s13  ;;  %s1176_s18 = smov %s874_s19 }
 0x115   : > { %s1177_s19 = smov %s1179_s5  ;;  %20 = sbr.rel (!%p18_p12) target bundleno = 7 (0x7), region = 92 }
 0x11a   :  { %523 = vsyncpa [#allocation3], 1 }
 0x11b   :  { %525 = vsyncpa [#allocation3 + $0x1], 1 }
 0x11c   :  { %526 = vsyncpa [#allocation6], 1 }
 0x11d   :  { %527 = vsyncpa [#allocation4], 1 }
 0x11e   :  { %529 = vsyncpa [#allocation4 + $0x1], 1 }

</bundles_post_ra>
